<compile_context>
chip_gen: v5e
topology: v5e:2x2
jax: 0.10.0
libtpu: 0.0.40
codegen_flags: <defaults>
</compile_context>

<pallas_src>
import functools

import jax
import jax.numpy as jnp
from jax import lax
from jax.experimental import pallas as pl
from jax.experimental.pallas import tpu as pltpu


def _round_up(x, m):
    return (x + m - 1) // m * m


def _linear_kernel(x_ref, w_ref, b_ref, o_ref):
    """One (tm, tn) output tile; K is the last ('arbitrary') grid axis.

    The output block is the f32 accumulator (its index_map ignores k), so no
    VMEM scratch is needed; bias is folded into the k == 0 initialisation.
    """
    k = pl.program_id(2)

    @pl.when(k == 0)
    def _():
        o_ref[...] = jnp.broadcast_to(b_ref[...], o_ref.shape).astype(o_ref.dtype)

    # x tile (tm, tk) contracted with weight tile (tn, tk) on their last dims
    # -> x @ W^T on the MXU (NT form, no transpose anywhere), f32 accumulate.
    o_ref[...] += lax.dot_general(
        x_ref[...], w_ref[...],
        dimension_numbers=(((1,), (1,)), ((), ())),
        preferred_element_type=jnp.float32,
    )


def _vmem_limit_bytes():
    """Per-generation VMEM budget with headroom (48 MiB on v7x, 96 MiB on v5e/v6e)."""
    try:
        cap = pltpu.get_tpu_info().vmem_capacity_bytes
    except Exception:
        cap = 64 * 1024 * 1024  # conservative fallback (v7x-sized)
    return min(int(cap * 3 // 4), 96 * 1024 * 1024)


@functools.partial(jax.jit, static_argnames=("tm", "tn", "tk", "use_bf16"))
def linear_classifier(x, weight, bias, *, tm=None, tn=512, tk=512, use_bf16=True):
    """Forward pass matching torch.nn.Linear: y = x @ weight.T + bias.

    x:      (B, D) float32
    weight: (C, D) float32  (PyTorch nn.Linear convention, NOT transposed here)
    bias:   (C,)   float32
    returns (B, C) float32
    """
    B, D = x.shape
    C = weight.shape[0]

    compute_dtype = jnp.bfloat16 if use_bf16 else x.dtype
    m_align = 16 if compute_dtype == jnp.bfloat16 else 8  # sublane packing

    B_min = _round_up(B, m_align)
    C_pad = _round_up(C, 128)
    D_pad = _round_up(D, 128)

    # Single M block for classifier-head shapes -> weight streamed from HBM once.
    if tm is None:
        tm = min(1024, B_min)
    tm = min(_round_up(tm, m_align), B_min)
    tn = min(_round_up(tn, 128), C_pad)
    tk = min(_round_up(tk, 128), D_pad)

    M_p = _round_up(B, tm)

    # v7x has 2 TensorCores sharded over "parallel" grid axes: if both M and N
    # would collapse to a single block, split N in two so neither core idles.
    if (M_p // tm == 1) and (C_pad // tn == 1) and (C_pad >= 2 * 128):
        tn = _round_up(C_pad // 2, 128)

    N_p = _round_up(C, tn)
    K_p = _round_up(D, tk)

    # bf16 compute, f32 accumulation. (In production the weights would already
    # live in bf16; here the cast halves the bytes the kernel streams.)
    x_c = x.astype(compute_dtype)
    w_c = weight.astype(compute_dtype)

    # Zero-padding: K is required for contraction correctness; M/N pads are
    # conditional no-ops when the shapes already align and only produce extra
    # rows/cols that are sliced off below.
    x_p = x_c if (M_p == B and K_p == D) else jnp.pad(
        x_c, ((0, M_p - B), (0, K_p - D)))
    w_p = w_c if (N_p == C and K_p == D) else jnp.pad(
        w_c, ((0, N_p - C), (0, K_p - D)))
    b_p = jnp.pad(bias.astype(jnp.float32), (0, N_p - C)).reshape(1, N_p)

    grid = (M_p // tm, N_p // tn, K_p // tk)

    out_p = pl.pallas_call(
        _linear_kernel,
        out_shape=jax.ShapeDtypeStruct((M_p, N_p), jnp.float32),
        grid=grid,
        in_specs=[
            pl.BlockSpec((tm, tk), lambda i, j, k: (i, k)),   # x tile
            pl.BlockSpec((tn, tk), lambda i, j, k: (j, k)),   # weight: indep. of M
            pl.BlockSpec((1, tn), lambda i, j, k: (0, j)),    # bias: const over K
        ],
        out_specs=pl.BlockSpec((tm, tn), lambda i, j, k: (i, j)),
        compiler_params=pltpu.CompilerParams(
            dimension_semantics=("parallel", "parallel", "arbitrary"),
            vmem_limit_bytes=_vmem_limit_bytes(),
        ),
    )(x_p, w_p, b_p)

    return out_p[:B, :C].astype(x.dtype)


if __name__ == "__main__":
    # Small shapes consistent with the module: batch=8, input_dim=32, num_classes=16
    B, D, C = 8, 32, 16
    key = jax.random.PRNGKey(0)
    kx, kw, kb = jax.random.split(key, 3)

    x = jax.random.normal(kx, (B, D), dtype=jnp.float32)
    # Deterministic parameter init (mimicking nn.Linear's uniform(-1/sqrt(D), 1/sqrt(D)))
    bound = 1.0 / jnp.sqrt(jnp.float32(D))
    weight = jax.random.uniform(kw, (C, D), dtype=jnp.float32, minval=-bound, maxval=bound)
    bias = jax.random.uniform(kb, (C,), dtype=jnp.float32, minval=-bound, maxval=bound)

    # Default fast path: bf16 inputs, f32 accumulation.
    out = linear_classifier(x, weight, bias)
    jax.block_until_ready(out)
    assert out.shape == (B, C)
    ref_bf16 = (x.astype(jnp.bfloat16).astype(jnp.float32)
                @ weight.astype(jnp.bfloat16).astype(jnp.float32).T + bias)
    assert jnp.allclose(out, ref_bf16, atol=1e-3, rtol=1e-3), "bf16 path mismatch"

    # Exact-precision path: f32 end to end, bit-for-bit comparable to torch f32.
    out_f32 = linear_classifier(x, weight, bias, use_bf16=False)
    jax.block_until_ready(out_f32)
    ref_f32 = x @ weight.T + bias
    assert jnp.allclose(out_f32, ref_f32, atol=1e-5, rtol=1e-5), "f32 path mismatch"

    print("KERNEL_OK")
</pallas_src>

<mosaic_0001>
module attributes {stable_mosaic.version = 11 : i64} {
  func.func @_linear_kernel(%arg0: i32, %arg1: i32, %arg2: i32, %arg3: memref<16x128xbf16, #tpu.memory_space<vmem>>, %arg4: memref<128x128xbf16, #tpu.memory_space<vmem>>, %arg5: memref<1x128xf32, #tpu.memory_space<vmem>>, %arg6: memref<16x128xf32, #tpu.memory_space<vmem>>) attributes {dimension_semantics = [#tpu.dimension_semantics<parallel>, #tpu.dimension_semantics<parallel>, #tpu.dimension_semantics<arbitrary>], iteration_bounds = array<i64: 1, 1, 1>, scalar_prefetch = 0 : i64, scratch_operands = 0 : i64, tpu.core_type = #tpu.core_type<tc>, window_params = [{transform_indices = @transform_0, window_bounds = array<i64: 16, 128>}, {transform_indices = @transform_1, window_bounds = array<i64: 128, 128>}, {transform_indices = @transform_2, window_bounds = array<i64: 1, 128>}, {transform_indices = @transform_3, window_bounds = array<i64: 16, 128>}]} {
    %c0_i32 = arith.constant 0 : i32
    %0 = arith.cmpi eq, %arg2, %c0_i32 : i32
    %1 = arith.extui %0 : i1 to i32
    %c0_i32_0 = arith.constant 0 : i32
    %2 = arith.cmpi ne, %1, %c0_i32_0 : i32
    scf.if %2 {
      %c0_8 = arith.constant 0 : index
      %c0_9 = arith.constant 0 : index
      %9 = vector.load %arg5[%c0_8, %c0_9] : memref<1x128xf32, #tpu.memory_space<vmem>>, vector<1x128xf32>
      %10 = vector.shape_cast %9 : vector<1x128xf32> to vector<1x128xf32>
      %11 = vector.broadcast %10 : vector<1x128xf32> to vector<16x128xf32>
      %c0_10 = arith.constant 0 : index
      %c0_11 = arith.constant 0 : index
      %12 = vector.load %arg6[%c0_10, %c0_11] : memref<16x128xf32, #tpu.memory_space<vmem>>, vector<16x128xf32>
      tpu.vector_store %arg6[%c0_10, %c0_11], %11 {strides = array<i32>} : memref<16x128xf32, #tpu.memory_space<vmem>>, vector<16x128xf32>,
    } else {
    }
    %c0 = arith.constant 0 : index
    %c0_1 = arith.constant 0 : index
    %3 = vector.load %arg6[%c0, %c0_1] : memref<16x128xf32, #tpu.memory_space<vmem>>, vector<16x128xf32>
    %c0_2 = arith.constant 0 : index
    %c0_3 = arith.constant 0 : index
    %4 = vector.load %arg3[%c0_2, %c0_3] : memref<16x128xbf16, #tpu.memory_space<vmem>>, vector<16x128xbf16>
    %c0_4 = arith.constant 0 : index
    %c0_5 = arith.constant 0 : index
    %5 = vector.load %arg4[%c0_4, %c0_5] : memref<128x128xbf16, #tpu.memory_space<vmem>>, vector<128x128xbf16>
    %cst = arith.constant dense<0.000000e+00> : vector<16x128xf32>
    %6 = tpu.matmul %4, %5, %cst {dimension_numbers = #tpu.dot_dimension_numbers<[1], [1], [0], [0], [0, 0, 1, 0], [], []>} : vector<16x128xbf16>, vector<128x128xbf16>, vector<16x128xf32> -> vector<16x128xf32>
    %7 = arith.addf %3, %6 : vector<16x128xf32>
    %c0_6 = arith.constant 0 : index
    %c0_7 = arith.constant 0 : index
    %8 = vector.load %arg6[%c0_6, %c0_7] : memref<16x128xf32, #tpu.memory_space<vmem>>, vector<16x128xf32>
    tpu.vector_store %arg6[%c0_6, %c0_7], %7 {strides = array<i32>} : memref<16x128xf32, #tpu.memory_space<vmem>>, vector<16x128xf32>,
    return
  }
  func.func @transform_0(%arg0: i32, %arg1: i32, %arg2: i32) -> (i32, i32) {
    %c0_i32 = arith.constant 0 : i32
    return %arg0, %arg2 : i32, i32
  }
  func.func @transform_1(%arg0: i32, %arg1: i32, %arg2: i32) -> (i32, i32) {
    %c0_i32 = arith.constant 0 : i32
    return %arg1, %arg2 : i32, i32
  }
  func.func @transform_2(%arg0: i32, %arg1: i32, %arg2: i32) -> (i32, i32) {
    %c0_i32 = arith.constant 0 : i32
    %c0_i32_0 = arith.constant 0 : i32
    return %c0_i32, %arg1 : i32, i32
  }
  func.func @transform_3(%arg0: i32, %arg1: i32, %arg2: i32) -> (i32, i32) {
    %c0_i32 = arith.constant 0 : i32
    return %arg0, %arg1 : i32, i32
  }
}

</mosaic_0001>

<bundles_post_ra>
// kernel: linear_classifier.1
= control target key start
LH: loop header
LB: loop body
LE: loop exit
PB: predicated region body
PF: predicated region fallthrough
CT: control target
= control target key end

     0   :  { %s222_s1 = inlined_call_operand.vmem [shape: bf16[128,128], index: 1, kind: input, shape index: {}]   ;;  %s223_s2 = inlined_call_operand.vmem [shape: f32[1,128], index: 2, kind: input, shape index: {}]   ;;  %s224_s0 = inlined_call_operand.vmem [shape: bf16[16,128], index: 0, kind: input, shape index: {}]   ;;  %s225_s3 = inlined_call_operand.vmem [shape: f32[16,128], index: 3, kind: output, shape index: {}]  }
   0x1   :  { %v164_v0 = vld [vmem:[%s222_s1 + $0x38] sm:$0xff]  ;;  %v163_v1 = vld [vmem:[%s222_s1 + $0x30] sm:$0xff]  ;;  %v162_v2 = vld [vmem:[%s222_s1 + $0x28] sm:$0xff] }
   0x2   :  { %98 = vmatpush.bf16.xpose.msra.mxu0 %v164_v0  ;;  %v161_v3 = vld [vmem:[%s222_s1 + $0x20] sm:$0xff]  ;;  %v160_v4 = vld [vmem:[%s222_s1 + $0x18] sm:$0xff]  ;;  %v159_v5 = vld [vmem:[%s222_s1 + $0x10] sm:$0xff] }
   0x3   :  { %v158_v6 = vld [vmem:[%s222_s1 + $0x8] sm:$0xff]  ;;  %v157_v7 = vld [vmem:[%s222_s1] sm:$0xff] }
   0x4   :  { %v156_v8 = vld [vmem:[%s224_s0] sm:$0xff] }
   0x5   :  { %v165_v9 = vld [vmem:[%s223_s2] ss:$0 sm:$0xff] }
   0xa   :  { %99 = vmatpush.bf16.xpose.msra.mxu0 %v163_v1 }
  0x12   :  { %100 = vmatpush.bf16.xpose.msra.mxu0 %v162_v2 }
  0x1a   :  { %101 = vmatpush.bf16.xpose.msra.mxu0 %v161_v3 }
  0x22   :  { %102 = vmatpush.bf16.xpose.msra.mxu0 %v160_v4 }
  0x2a   :  { %103 = vmatpush.bf16.xpose.msra.mxu0 %v159_v5 }
  0x32   :  { %104 = vmatpush.bf16.xpose.msra.mxu0 %v158_v6 }
  0x3a   :  { %105 = vmatpush.bf16.xpose.msra.mxu0 %v157_v7 }
  0x41   :  { %106 = vmatmul.bf16.vlgmr.msra.gmra.mxu0 %v156_v8 }
  0xbe   :  { %v107_v10 = vpop.f32.mrf.mxu0 }
  0xbf   :  { %v112_v11 = vadd.f32 %v165_v9, %v107_v10 }
  0xc1   :  { %114 = vst [vmem:[%s225_s3] sm:$0xff] %v112_v11 }
  0xc6   :  { %v109_v12 = vpop.f32.mrf.mxu0 }
  0xc7   :  { %v113_v13 = vadd.f32 %v165_v9, %v109_v12 }
  0xc9   :  { %115 = vst [vmem:[%s225_s3 + $0x8] sm:$0xff] %v113_v13 }

</bundles_post_ra>
